<compile_context>
chip_gen: v6e
topology: v6e:2x2x1
jax: 0.10.0
libtpu: 0.0.40
codegen_flags: <defaults>
</compile_context>

<pallas_src>
import functools

import jax
import jax.numpy as jnp
from jax.experimental import pallas as pl
from jax.experimental.pallas import tpu as pltpu

_LANE = 128
_ROW_GRAN = 16   # row-tile granularity: safe for both f32 (8) and bf16 (16) sublane packing


def _round_up(x, m):
    return (x + m - 1) // m * m


def _pad2d(x, rows, cols):
    r, c = x.shape
    if r == rows and c == cols:
        return x
    return jnp.pad(x, ((0, rows - r), (0, cols - c)))


def _vmem_capacity_bytes():
    """Per-TensorCore VMEM capacity; conservative (v7x) fallback if the query fails."""
    try:
        return int(pltpu.get_tpu_info().vmem_capacity_bytes)
    except Exception:
        return 64 << 20


def _ffn_kernel(xr_ref, xp_ref, w1_ref, w2_ref,
                b1d_ref, b1s_ref, b2d_ref, b2s_ref,
                gamma_ref, beta_ref, or_ref, op_ref, *, d_valid):
    f32, bf16 = jnp.float32, jnp.bfloat16
    hp = w1_ref.shape[1] // 2       # padded d_hid
    dp = w2_ref.shape[1] // 2       # padded d_in

    # Activations may arrive as f32 (no-pad fast path) or bf16 (padded path).
    xr = xr_ref[...].astype(bf16)   # (tile, dp)
    xp = xp_ref[...].astype(bf16)

    # LayerNorm constants, hoisted once per invocation and reused for both LN calls.
    # Padded columns of z are exactly zero (zero-padded x/weights/biases), so a plain
    # row-sum equals the valid-column sum; only the variance needs the mask.
    if dp != d_valid:
        mask = jax.lax.broadcasted_iota(jnp.int32, (1, dp), 1) < d_valid
    else:
        mask = None
    inv_n = 1.0 / float(d_valid)
    gamma = gamma_ref[...]
    beta = beta_ref[...]
    eps = 1e-5

    def layer_norm(z):
        mu = jnp.sum(z, axis=-1, keepdims=True) * inv_n
        centered = z - mu
        if mask is not None:
            centered = jnp.where(mask, centered, 0.0)
        var = jnp.sum(centered * centered, axis=-1, keepdims=True) * inv_n
        return centered * jax.lax.rsqrt(var + eps) * gamma + beta

    # ---- Stage 1 (first 1x1 conv), one hidden output at a time (short live ranges).
    # Static, 128-aligned ref slices of the packed weights are free.
    h_r = jnp.maximum(
        jnp.dot(xr, w1_ref[:, :hp], preferred_element_type=f32)
        - jnp.dot(xp, w1_ref[:, hp:], preferred_element_type=f32)
        + b1d_ref[...], 0.0).astype(bf16)
    h_p = jnp.maximum(
        jnp.dot(xp, w1_ref[:, :hp], preferred_element_type=f32)
        + jnp.dot(xr, w1_ref[:, hp:], preferred_element_type=f32)
        + b1s_ref[...], 0.0).astype(bf16)

    # ---- Stage 2 (second 1x1 conv) + residual + LayerNorm; real part fully retired
    # before the phase part is computed, halving peak f32 temporaries.
    y_r = (jnp.dot(h_r, w2_ref[:, :dp], preferred_element_type=f32)
           - jnp.dot(h_p, w2_ref[:, dp:], preferred_element_type=f32)
           + b2d_ref[...])
    or_ref[...] = layer_norm(y_r + xr.astype(f32)).astype(or_ref.dtype)

    y_p = (jnp.dot(h_p, w2_ref[:, :dp], preferred_element_type=f32)
           + jnp.dot(h_r, w2_ref[:, dp:], preferred_element_type=f32)
           + b2s_ref[...])
    op_ref[...] = layer_norm(y_p + xp.astype(f32)).astype(op_ref.dtype)


@functools.partial(jax.jit, static_argnames=("tile_rows", "out_dtype"))
def positionwise_ffn(x_real, x_phase, params, *, tile_rows=512, out_dtype=jnp.bfloat16):
    f32, bf16 = jnp.float32, jnp.bfloat16
    B, L, d_in = x_real.shape
    d_hid = params["w1r"].shape[1]
    rows = B * L

    dp = _round_up(d_in, _LANE)          # lane-dense feature dim
    hp = _round_up(d_hid, _LANE)         # lane-dense hidden dim

    # --- Row tiling: guarantee >=2 grid steps when rows allow it (v7x: 2 TensorCores). ---
    tile = max(_ROW_GRAN, min(tile_rows, _round_up(rows, _ROW_GRAN)))
    while tile > _ROW_GRAN and pl.cdiv(rows, tile) < 2:
        tile = max(_ROW_GRAN, _round_up(tile // 2, _ROW_GRAN))

    # --- Generation-aware VMEM budgeting. ---
    vmem_cap = _vmem_capacity_bytes()
    headroom = 8 << 20
    weight_bytes = (dp * 2 * hp + hp * 2 * dp) * 2           # packed bf16 W1cat + W2cat
    small_bytes = (2 * hp + 4 * dp) * 4 + (1 << 20)          # biases/gamma/beta + slack
    out_bytes = jnp.dtype(out_dtype).itemsize
    # Keep weights resident (single VMEM copy) when they fit in ~1/3 of usable VMEM,
    # otherwise stream them through the pipelined constant-index-map path.
    resident_weights = (weight_bytes + small_bytes) <= (vmem_cap - headroom) // 3

    def budget(t):
        act = 2 * 2 * t * dp * (4 + out_bytes)               # in (<=f32) + out, dbl-buffered
        inter = t * (2 * hp + 2 * dp) * 4 + 2 * t * hp * 2   # peak f32 temps + bf16 h_r/h_p
        wts = (weight_bytes + small_bytes) * (1 if resident_weights else 2)
        return act + inter + wts

    while tile > _ROW_GRAN and budget(tile) > vmem_cap - headroom:
        tile = max(_ROW_GRAN, _round_up(tile // 2, _ROW_GRAN))

    rp = _round_up(rows, tile)
    num_tiles = rp // tile
    need_row_pad = rp != rows
    need_col_pad = dp != d_in

    # --- Activations: avoid a wrapper-side HBM pass when no padding is needed. ---
    if need_row_pad or need_col_pad:
        # Fuse pad + bf16 cast into one wrapper pass (half-width write).
        xr2 = _pad2d(x_real.reshape(rows, d_in), rp, dp).astype(bf16)
        xp2 = _pad2d(x_phase.reshape(rows, d_in), rp, dp).astype(bf16)
    else:
        # Pass f32 straight in; the kernel casts to bf16 after load.
        xr2 = x_real.reshape(rows, d_in)
        xp2 = x_phase.reshape(rows, d_in)

    # --- Packed + padded bf16 weights; folded f32 biases (each added exactly once). ---
    w1 = jnp.concatenate([_pad2d(params["w1r"], dp, hp),
                          _pad2d(params["w1p"], dp, hp)], axis=1).astype(bf16)
    w2 = jnp.concatenate([_pad2d(params["w2r"], hp, dp),
                          _pad2d(params["w2p"], hp, dp)], axis=1).astype(bf16)
    b1d = _pad2d(params["b1r"] - params["b1p"], 1, hp).astype(f32)
    b1s = _pad2d(params["b1r"] + params["b1p"], 1, hp).astype(f32)
    b2d = _pad2d(params["b2r"] - params["b2p"], 1, dp).astype(f32)
    b2s = _pad2d(params["b2r"] + params["b2p"], 1, dp).astype(f32)
    gamma = _pad2d(params["gamma"], 1, dp).astype(f32)
    beta = _pad2d(params["beta"], 1, dp).astype(f32)

    row_spec = pl.BlockSpec((tile, dp), lambda i: (i, 0))
    if resident_weights:
        def cspec(shape):
            # Whole array resident in VMEM: single copy, no double-buffering.
            return pl.BlockSpec(memory_space=pltpu.MemorySpace.VMEM)
    else:
        def cspec(shape):
            # Streamed: full-array block, constant index map (re-used across steps).
            return pl.BlockSpec(shape, lambda i: (0, 0))

    vmem_limit = int(min(vmem_cap - headroom,
                         max(32 << 20, int(1.25 * budget(tile)))))
    vmem_limit = max(vmem_limit, 4 << 20)

    kernel = functools.partial(_ffn_kernel, d_valid=d_in)
    out_r, out_p = pl.pallas_call(
        kernel,
        out_shape=(jax.ShapeDtypeStruct((rp, dp), out_dtype),
                   jax.ShapeDtypeStruct((rp, dp), out_dtype)),
        grid_spec=pltpu.PrefetchScalarGridSpec(
            num_scalar_prefetch=0,
            grid=(num_tiles,),
            in_specs=[
                row_spec, row_spec,                      # x_real, x_phase row tiles
                cspec(w1.shape), cspec(w2.shape),        # packed weights
                cspec(b1d.shape), cspec(b1s.shape),      # folded stage-1 biases
                cspec(b2d.shape), cspec(b2s.shape),      # folded stage-2 biases
                cspec(gamma.shape), cspec(beta.shape),   # LayerNorm affine
            ],
            out_specs=[row_spec, row_spec],
        ),
        compiler_params=pltpu.CompilerParams(
            dimension_semantics=("parallel",),
            vmem_limit_bytes=vmem_limit),
    )(xr2, xp2, w1, w2, b1d, b1s, b2d, b2s, gamma, beta)

    if need_row_pad or need_col_pad:
        out_r = out_r[:rows, :d_in]
        out_p = out_p[:rows, :d_in]
    return out_r.reshape(B, L, d_in), out_p.reshape(B, L, d_in)


def reference_ffn(x_real, x_phase, params):
    """Plain-JAX reference mirroring the PyTorch module (eval mode), using the same
    bf16-operand / f32-accumulation matmul policy as the kernel."""
    f32, bf16 = jnp.float32, jnp.bfloat16
    xr = x_real.astype(bf16)
    xp = x_phase.astype(bf16)

    def mm(a, w):
        return jnp.dot(a.astype(bf16), w.astype(bf16), preferred_element_type=f32)

    a_r = mm(xr, params["w1r"]) + params["b1r"]
    a_p = mm(xp, params["w1p"]) + params["b1p"]
    c_r = mm(xp, params["w1r"]) + params["b1r"]
    c_p = mm(xr, params["w1p"]) + params["b1p"]
    h_r = jax.nn.relu(a_r - a_p)
    h_p = jax.nn.relu(c_r + c_p)
    y_r = (mm(h_r, params["w2r"]) + params["b2r"]) - (mm(h_p, params["w2p"]) + params["b2p"])
    y_p = (mm(h_p, params["w2r"]) + params["b2r"]) + (mm(h_r, params["w2p"]) + params["b2p"])

    def ln(z):
        mu = jnp.mean(z, axis=-1, keepdims=True)
        c = z - mu
        var = jnp.mean(c * c, axis=-1, keepdims=True)
        return c * jax.lax.rsqrt(var + 1e-5) * params["gamma"] + params["beta"]

    return ln(y_r + xr.astype(f32)), ln(y_p + xp.astype(f32))


def make_params(key, d_in, d_hid):
    ks = jax.random.split(key, 8)
    scale1 = 1.0 / jnp.sqrt(d_in)
    scale2 = 1.0 / jnp.sqrt(d_hid)
    # Conv1d(d_in, d_hid, 1) weight is (d_hid, d_in, 1) in torch; we store the
    # transposed (d_in, d_hid) matrix so the kernel does `x @ W`.
    return {
        "w1r": jax.random.uniform(ks[0], (d_in, d_hid), jnp.float32, -scale1, scale1),
        "w1p": jax.random.uniform(ks[1], (d_in, d_hid), jnp.float32, -scale1, scale1),
        "b1r": jax.random.uniform(ks[2], (1, d_hid), jnp.float32, -scale1, scale1),
        "b1p": jax.random.uniform(ks[3], (1, d_hid), jnp.float32, -scale1, scale1),
        "w2r": jax.random.uniform(ks[4], (d_hid, d_in), jnp.float32, -scale2, scale2),
        "w2p": jax.random.uniform(ks[5], (d_hid, d_in), jnp.float32, -scale2, scale2),
        "b2r": jax.random.uniform(ks[6], (1, d_in), jnp.float32, -scale2, scale2),
        "b2p": jax.random.uniform(ks[7], (1, d_in), jnp.float32, -scale2, scale2),
        "gamma": jnp.ones((1, d_in), jnp.float32),
        "beta": jnp.zeros((1, d_in), jnp.float32),
    }


if __name__ == "__main__":
    B, L, d_in, d_hid = 2, 8, 32, 64
    key = jax.random.PRNGKey(0)
    k_xr, k_xp, k_p = jax.random.split(key, 3)

    x_real = jax.random.normal(k_xr, (B, L, d_in), jnp.float32)
    x_phase = jax.random.normal(k_xp, (B, L, d_in), jnp.float32)
    params = make_params(k_p, d_in, d_hid)

    out_r, out_p = positionwise_ffn(x_real, x_phase, params)
    jax.block_until_ready((out_r, out_p))

    ref_r, ref_p = reference_ffn(x_real, x_phase, params)
    # bf16 outputs + bf16 MXU operands (f32 accumulation): allow ~1 bf16 ulp of slack.
    err_r = float(jnp.max(jnp.abs(out_r.astype(jnp.float32) - ref_r)))
    err_p = float(jnp.max(jnp.abs(out_p.astype(jnp.float32) - ref_p)))
    assert err_r < 3e-2, err_r
    assert err_p < 3e-2, err_p

    print("KERNEL_OK")
</pallas_src>

<mosaic_0001>
module attributes {stable_mosaic.version = 11 : i64} {
  func.func @_ffn_kernel(%arg0: i32, %arg1: memref<16x128xbf16, #tpu.memory_space<vmem>>, %arg2: memref<16x128xbf16, #tpu.memory_space<vmem>>, %arg3: memref<128x256xbf16, #tpu.memory_space<vmem>>, %arg4: memref<128x256xbf16, #tpu.memory_space<vmem>>, %arg5: memref<1x128xf32, #tpu.memory_space<vmem>>, %arg6: memref<1x128xf32, #tpu.memory_space<vmem>>, %arg7: memref<1x128xf32, #tpu.memory_space<vmem>>, %arg8: memref<1x128xf32, #tpu.memory_space<vmem>>, %arg9: memref<1x128xf32, #tpu.memory_space<vmem>>, %arg10: memref<1x128xf32, #tpu.memory_space<vmem>>, %arg11: memref<16x128xbf16, #tpu.memory_space<vmem>>, %arg12: memref<16x128xbf16, #tpu.memory_space<vmem>>) attributes {dimension_semantics = [#tpu.dimension_semantics<parallel>], iteration_bounds = array<i64: 1>, scalar_prefetch = 0 : i64, scratch_operands = 0 : i64, tpu.core_type = #tpu.core_type<tc>, window_params = [{transform_indices = @transform_0, window_bounds = array<i64: 16, 128>}, {transform_indices = @transform_1, window_bounds = array<i64: 16, 128>}, {pipeline_mode = #tpu.pipeline_mode<synchronous>, transform_indices = @transform_2, window_bounds = array<i64: 128, 256>}, {pipeline_mode = #tpu.pipeline_mode<synchronous>, transform_indices = @transform_3, window_bounds = array<i64: 128, 256>}, {pipeline_mode = #tpu.pipeline_mode<synchronous>, transform_indices = @transform_4, window_bounds = array<i64: 1, 128>}, {pipeline_mode = #tpu.pipeline_mode<synchronous>, transform_indices = @transform_5, window_bounds = array<i64: 1, 128>}, {pipeline_mode = #tpu.pipeline_mode<synchronous>, transform_indices = @transform_6, window_bounds = array<i64: 1, 128>}, {pipeline_mode = #tpu.pipeline_mode<synchronous>, transform_indices = @transform_7, window_bounds = array<i64: 1, 128>}, {pipeline_mode = #tpu.pipeline_mode<synchronous>, transform_indices = @transform_8, window_bounds = array<i64: 1, 128>}, {pipeline_mode = #tpu.pipeline_mode<synchronous>, transform_indices = @transform_9, window_bounds = array<i64: 1, 128>}, {transform_indices = @transform_10, window_bounds = array<i64: 16, 128>}, {transform_indices = @transform_11, window_bounds = array<i64: 16, 128>}]} {
    %c0 = arith.constant 0 : index
    %c0_0 = arith.constant 0 : index
    %0 = vector.load %arg1[%c0, %c0_0] : memref<16x128xbf16, #tpu.memory_space<vmem>>, vector<16x128xbf16>
    %c0_1 = arith.constant 0 : index
    %c0_2 = arith.constant 0 : index
    %1 = vector.load %arg2[%c0_1, %c0_2] : memref<16x128xbf16, #tpu.memory_space<vmem>>, vector<16x128xbf16>
    %2 = tpu.iota {dimensions = array<i32: 1>} : vector<1x128xi32>
    %c32_i32 = arith.constant 32 : i32
    %3 = vector.broadcast %c32_i32 : i32 to vector<1x128xi32>
    %4 = arith.cmpi slt, %2, %3 : vector<1x128xi32>
    %c0_3 = arith.constant 0 : index
    %c0_4 = arith.constant 0 : index
    %5 = vector.load %arg9[%c0_3, %c0_4] : memref<1x128xf32, #tpu.memory_space<vmem>>, vector<1x128xf32>
    %c0_5 = arith.constant 0 : index
    %c0_6 = arith.constant 0 : index
    %6 = vector.load %arg10[%c0_5, %c0_6] : memref<1x128xf32, #tpu.memory_space<vmem>>, vector<1x128xf32>
    %c0_7 = arith.constant 0 : index
    %c0_8 = arith.constant 0 : index
    %7 = vector.load %arg3[%c0_7, %c0_8] : memref<128x256xbf16, #tpu.memory_space<vmem>>, vector<128x128xbf16>
    %cst = arith.constant dense<0.000000e+00> : vector<16x128xf32>
    %8 = tpu.matmul %0, %7, %cst {dimension_numbers = #tpu.dot_dimension_numbers<[1], [0], [0], [1], [0, 0, 1, 1], [], []>} : vector<16x128xbf16>, vector<128x128xbf16>, vector<16x128xf32> -> vector<16x128xf32>
    %c0_9 = arith.constant 0 : index
    %c128 = arith.constant 128 : index
    %9 = vector.load %arg3[%c0_9, %c128] : memref<128x256xbf16, #tpu.memory_space<vmem>>, vector<128x128xbf16>
    %cst_10 = arith.constant dense<0.000000e+00> : vector<16x128xf32>
    %10 = tpu.matmul %1, %9, %cst_10 {dimension_numbers = #tpu.dot_dimension_numbers<[1], [0], [0], [1], [0, 0, 1, 1], [], []>} : vector<16x128xbf16>, vector<128x128xbf16>, vector<16x128xf32> -> vector<16x128xf32>
    %11 = arith.subf %8, %10 : vector<16x128xf32>
    %c0_11 = arith.constant 0 : index
    %c0_12 = arith.constant 0 : index
    %12 = vector.load %arg5[%c0_11, %c0_12] : memref<1x128xf32, #tpu.memory_space<vmem>>, vector<1x128xf32>
    %13 = vector.broadcast %12 : vector<1x128xf32> to vector<16x128xf32>
    %14 = arith.addf %11, %13 : vector<16x128xf32>
    %cst_13 = arith.constant 0.000000e+00 : f32
    %15 = vector.broadcast %cst_13 : f32 to vector<16x128xf32>
    %16 = arith.maximumf %14, %15 : vector<16x128xf32>
    %17 = arith.truncf %16 : vector<16x128xf32> to vector<16x128xbf16>
    %c0_14 = arith.constant 0 : index
    %c0_15 = arith.constant 0 : index
    %18 = vector.load %arg3[%c0_14, %c0_15] : memref<128x256xbf16, #tpu.memory_space<vmem>>, vector<128x128xbf16>
    %cst_16 = arith.constant dense<0.000000e+00> : vector<16x128xf32>
    %19 = tpu.matmul %1, %18, %cst_16 {dimension_numbers = #tpu.dot_dimension_numbers<[1], [0], [0], [1], [0, 0, 1, 1], [], []>} : vector<16x128xbf16>, vector<128x128xbf16>, vector<16x128xf32> -> vector<16x128xf32>
    %c0_17 = arith.constant 0 : index
    %c128_18 = arith.constant 128 : index
    %20 = vector.load %arg3[%c0_17, %c128_18] : memref<128x256xbf16, #tpu.memory_space<vmem>>, vector<128x128xbf16>
    %cst_19 = arith.constant dense<0.000000e+00> : vector<16x128xf32>
    %21 = tpu.matmul %0, %20, %cst_19 {dimension_numbers = #tpu.dot_dimension_numbers<[1], [0], [0], [1], [0, 0, 1, 1], [], []>} : vector<16x128xbf16>, vector<128x128xbf16>, vector<16x128xf32> -> vector<16x128xf32>
    %22 = arith.addf %19, %21 : vector<16x128xf32>
    %c0_20 = arith.constant 0 : index
    %c0_21 = arith.constant 0 : index
    %23 = vector.load %arg6[%c0_20, %c0_21] : memref<1x128xf32, #tpu.memory_space<vmem>>, vector<1x128xf32>
    %24 = vector.broadcast %23 : vector<1x128xf32> to vector<16x128xf32>
    %25 = arith.addf %22, %24 : vector<16x128xf32>
    %cst_22 = arith.constant 0.000000e+00 : f32
    %26 = vector.broadcast %cst_22 : f32 to vector<16x128xf32>
    %27 = arith.maximumf %25, %26 : vector<16x128xf32>
    %28 = arith.truncf %27 : vector<16x128xf32> to vector<16x128xbf16>
    %c0_23 = arith.constant 0 : index
    %c0_24 = arith.constant 0 : index
    %29 = vector.load %arg4[%c0_23, %c0_24] : memref<128x256xbf16, #tpu.memory_space<vmem>>, vector<128x128xbf16>
    %cst_25 = arith.constant dense<0.000000e+00> : vector<16x128xf32>
    %30 = tpu.matmul %17, %29, %cst_25 {dimension_numbers = #tpu.dot_dimension_numbers<[1], [0], [0], [1], [0, 0, 1, 1], [], []>} : vector<16x128xbf16>, vector<128x128xbf16>, vector<16x128xf32> -> vector<16x128xf32>
    %c0_26 = arith.constant 0 : index
    %c128_27 = arith.constant 128 : index
    %31 = vector.load %arg4[%c0_26, %c128_27] : memref<128x256xbf16, #tpu.memory_space<vmem>>, vector<128x128xbf16>
    %cst_28 = arith.constant dense<0.000000e+00> : vector<16x128xf32>
    %32 = tpu.matmul %28, %31, %cst_28 {dimension_numbers = #tpu.dot_dimension_numbers<[1], [0], [0], [1], [0, 0, 1, 1], [], []>} : vector<16x128xbf16>, vector<128x128xbf16>, vector<16x128xf32> -> vector<16x128xf32>
    %33 = arith.subf %30, %32 : vector<16x128xf32>
    %c0_29 = arith.constant 0 : index
    %c0_30 = arith.constant 0 : index
    %34 = vector.load %arg7[%c0_29, %c0_30] : memref<1x128xf32, #tpu.memory_space<vmem>>, vector<1x128xf32>
    %35 = vector.broadcast %34 : vector<1x128xf32> to vector<16x128xf32>
    %36 = arith.addf %33, %35 : vector<16x128xf32>
    %37 = arith.extf %0 : vector<16x128xbf16> to vector<16x128xf32>
    %38 = arith.addf %36, %37 : vector<16x128xf32>
    %cst_31 = arith.constant dense<0.000000e+00> : vector<16xf32>
    %39 = vector.multi_reduction <add>, %38, %cst_31 [1] : vector<16x128xf32> to vector<16xf32>
    %40 = vector.shape_cast %39 : vector<16xf32> to vector<16x1xf32>
    %cst_32 = arith.constant 3.125000e-02 : f32
    %41 = vector.broadcast %cst_32 : f32 to vector<16x1xf32>
    %42 = arith.mulf %40, %41 : vector<16x1xf32>
    %43 = vector.broadcast %42 : vector<16x1xf32> to vector<16x128xf32>
    %44 = arith.subf %38, %43 : vector<16x128xf32>
    %cst_33 = arith.constant 0.000000e+00 : f32
    %45 = vector.shape_cast %4 : vector<1x128xi1> to vector<1x128xi1>
    %46 = vector.broadcast %45 : vector<1x128xi1> to vector<16x128xi1>
    %47 = vector.broadcast %cst_33 : f32 to vector<16x128xf32>
    %48 = arith.select %46, %44, %47 : vector<16x128xi1>, vector<16x128xf32>
    %49 = arith.mulf %48, %48 : vector<16x128xf32>
    %cst_34 = arith.constant dense<0.000000e+00> : vector<16xf32>
    %50 = vector.multi_reduction <add>, %49, %cst_34 [1] : vector<16x128xf32> to vector<16xf32>
    %51 = vector.shape_cast %50 : vector<16xf32> to vector<16x1xf32>
    %cst_35 = arith.constant 3.125000e-02 : f32
    %52 = vector.broadcast %cst_35 : f32 to vector<16x1xf32>
    %53 = arith.mulf %51, %52 : vector<16x1xf32>
    %cst_36 = arith.constant 9.99999974E-6 : f32
    %54 = vector.broadcast %cst_36 : f32 to vector<16x1xf32>
    %55 = arith.addf %53, %54 : vector<16x1xf32>
    %56 = math.rsqrt %55 : vector<16x1xf32>
    %57 = vector.broadcast %56 : vector<16x1xf32> to vector<16x128xf32>
    %58 = arith.mulf %48, %57 : vector<16x128xf32>
    %59 = vector.broadcast %5 : vector<1x128xf32> to vector<16x128xf32>
    %60 = arith.mulf %58, %59 : vector<16x128xf32>
    %61 = vector.broadcast %6 : vector<1x128xf32> to vector<16x128xf32>
    %62 = arith.addf %60, %61 : vector<16x128xf32>
    %63 = arith.truncf %62 : vector<16x128xf32> to vector<16x128xbf16>
    %c0_37 = arith.constant 0 : index
    %c0_38 = arith.constant 0 : index
    %64 = vector.load %arg11[%c0_37, %c0_38] : memref<16x128xbf16, #tpu.memory_space<vmem>>, vector<16x128xbf16>
    tpu.vector_store %arg11[%c0_37, %c0_38], %63 {strides = array<i32>} : memref<16x128xbf16, #tpu.memory_space<vmem>>, vector<16x128xbf16>,
    %c0_39 = arith.constant 0 : index
    %c0_40 = arith.constant 0 : index
    %65 = vector.load %arg4[%c0_39, %c0_40] : memref<128x256xbf16, #tpu.memory_space<vmem>>, vector<128x128xbf16>
    %cst_41 = arith.constant dense<0.000000e+00> : vector<16x128xf32>
    %66 = tpu.matmul %28, %65, %cst_41 {dimension_numbers = #tpu.dot_dimension_numbers<[1], [0], [0], [1], [0, 0, 1, 1], [], []>} : vector<16x128xbf16>, vector<128x128xbf16>, vector<16x128xf32> -> vector<16x128xf32>
    %c0_42 = arith.constant 0 : index
    %c128_43 = arith.constant 128 : index
    %67 = vector.load %arg4[%c0_42, %c128_43] : memref<128x256xbf16, #tpu.memory_space<vmem>>, vector<128x128xbf16>
    %cst_44 = arith.constant dense<0.000000e+00> : vector<16x128xf32>
    %68 = tpu.matmul %17, %67, %cst_44 {dimension_numbers = #tpu.dot_dimension_numbers<[1], [0], [0], [1], [0, 0, 1, 1], [], []>} : vector<16x128xbf16>, vector<128x128xbf16>, vector<16x128xf32> -> vector<16x128xf32>
    %69 = arith.addf %66, %68 : vector<16x128xf32>
    %c0_45 = arith.constant 0 : index
    %c0_46 = arith.constant 0 : index
    %70 = vector.load %arg8[%c0_45, %c0_46] : memref<1x128xf32, #tpu.memory_space<vmem>>, vector<1x128xf32>
    %71 = vector.broadcast %70 : vector<1x128xf32> to vector<16x128xf32>
    %72 = arith.addf %69, %71 : vector<16x128xf32>
    %73 = arith.extf %1 : vector<16x128xbf16> to vector<16x128xf32>
    %74 = arith.addf %72, %73 : vector<16x128xf32>
    %cst_47 = arith.constant dense<0.000000e+00> : vector<16xf32>
    %75 = vector.multi_reduction <add>, %74, %cst_47 [1] : vector<16x128xf32> to vector<16xf32>
    %76 = vector.shape_cast %75 : vector<16xf32> to vector<16x1xf32>
    %cst_48 = arith.constant 3.125000e-02 : f32
    %77 = vector.broadcast %cst_48 : f32 to vector<16x1xf32>
    %78 = arith.mulf %76, %77 : vector<16x1xf32>
    %79 = vector.broadcast %78 : vector<16x1xf32> to vector<16x128xf32>
    %80 = arith.subf %74, %79 : vector<16x128xf32>
    %cst_49 = arith.constant 0.000000e+00 : f32
    %81 = vector.shape_cast %4 : vector<1x128xi1> to vector<1x128xi1>
    %82 = vector.broadcast %81 : vector<1x128xi1> to vector<16x128xi1>
    %83 = vector.broadcast %cst_49 : f32 to vector<16x128xf32>
    %84 = arith.select %82, %80, %83 : vector<16x128xi1>, vector<16x128xf32>
    %85 = arith.mulf %84, %84 : vector<16x128xf32>
    %cst_50 = arith.constant dense<0.000000e+00> : vector<16xf32>
    %86 = vector.multi_reduction <add>, %85, %cst_50 [1] : vector<16x128xf32> to vector<16xf32>
    %87 = vector.shape_cast %86 : vector<16xf32> to vector<16x1xf32>
    %cst_51 = arith.constant 3.125000e-02 : f32
    %88 = vector.broadcast %cst_51 : f32 to vector<16x1xf32>
    %89 = arith.mulf %87, %88 : vector<16x1xf32>
    %cst_52 = arith.constant 9.99999974E-6 : f32
    %90 = vector.broadcast %cst_52 : f32 to vector<16x1xf32>
    %91 = arith.addf %89, %90 : vector<16x1xf32>
    %92 = math.rsqrt %91 : vector<16x1xf32>
    %93 = vector.broadcast %92 : vector<16x1xf32> to vector<16x128xf32>
    %94 = arith.mulf %84, %93 : vector<16x128xf32>
    %95 = vector.broadcast %5 : vector<1x128xf32> to vector<16x128xf32>
    %96 = arith.mulf %94, %95 : vector<16x128xf32>
    %97 = vector.broadcast %6 : vector<1x128xf32> to vector<16x128xf32>
    %98 = arith.addf %96, %97 : vector<16x128xf32>
    %99 = arith.truncf %98 : vector<16x128xf32> to vector<16x128xbf16>
    %c0_53 = arith.constant 0 : index
    %c0_54 = arith.constant 0 : index
    %100 = vector.load %arg12[%c0_53, %c0_54] : memref<16x128xbf16, #tpu.memory_space<vmem>>, vector<16x128xbf16>
    tpu.vector_store %arg12[%c0_53, %c0_54], %99 {strides = array<i32>} : memref<16x128xbf16, #tpu.memory_space<vmem>>, vector<16x128xbf16>,
    return
  }
  func.func @transform_0(%arg0: i32) -> (i32, i32) {
    %c0_i32 = arith.constant 0 : i32
    %c0_i32_0 = arith.constant 0 : i32
    return %arg0, %c0_i32 : i32, i32
  }
  func.func @transform_1(%arg0: i32) -> (i32, i32) {
    %c0_i32 = arith.constant 0 : i32
    %c0_i32_0 = arith.constant 0 : i32
    return %arg0, %c0_i32 : i32, i32
  }
  func.func @transform_2(%arg0: i32) -> (i32, i32) {
    %c0_i32 = arith.constant 0 : i32
    %c0_i32_0 = arith.constant 0 : i32
    %c0_i32_1 = arith.constant 0 : i32
    return %c0_i32, %c0_i32_0 : i32, i32
  }
  func.func @transform_3(%arg0: i32) -> (i32, i32) {
    %c0_i32 = arith.constant 0 : i32
    %c0_i32_0 = arith.constant 0 : i32
    %c0_i32_1 = arith.constant 0 : i32
    return %c0_i32, %c0_i32_0 : i32, i32
  }
  func.func @transform_4(%arg0: i32) -> (i32, i32) {
    %c0_i32 = arith.constant 0 : i32
    %c0_i32_0 = arith.constant 0 : i32
    %c0_i32_1 = arith.constant 0 : i32
    return %c0_i32, %c0_i32_0 : i32, i32
  }
  func.func @transform_5(%arg0: i32) -> (i32, i32) {
    %c0_i32 = arith.constant 0 : i32
    %c0_i32_0 = arith.constant 0 : i32
    %c0_i32_1 = arith.constant 0 : i32
    return %c0_i32, %c0_i32_0 : i32, i32
  }
  func.func @transform_6(%arg0: i32) -> (i32, i32) {
    %c0_i32 = arith.constant 0 : i32
    %c0_i32_0 = arith.constant 0 : i32
    %c0_i32_1 = arith.constant 0 : i32
    return %c0_i32, %c0_i32_0 : i32, i32
  }
  func.func @transform_7(%arg0: i32) -> (i32, i32) {
    %c0_i32 = arith.constant 0 : i32
    %c0_i32_0 = arith.constant 0 : i32
    %c0_i32_1 = arith.constant 0 : i32
    return %c0_i32, %c0_i32_0 : i32, i32
  }
  func.func @transform_8(%arg0: i32) -> (i32, i32) {
    %c0_i32 = arith.constant 0 : i32
    %c0_i32_0 = arith.constant 0 : i32
    %c0_i32_1 = arith.constant 0 : i32
    return %c0_i32, %c0_i32_0 : i32, i32
  }
  func.func @transform_9(%arg0: i32) -> (i32, i32) {
    %c0_i32 = arith.constant 0 : i32
    %c0_i32_0 = arith.constant 0 : i32
    %c0_i32_1 = arith.constant 0 : i32
    return %c0_i32, %c0_i32_0 : i32, i32
  }
  func.func @transform_10(%arg0: i32) -> (i32, i32) {
    %c0_i32 = arith.constant 0 : i32
    %c0_i32_0 = arith.constant 0 : i32
    return %arg0, %c0_i32 : i32, i32
  }
  func.func @transform_11(%arg0: i32) -> (i32, i32) {
    %c0_i32 = arith.constant 0 : i32
    %c0_i32_0 = arith.constant 0 : i32
    return %arg0, %c0_i32 : i32, i32
  }
}

</mosaic_0001>

<bundles_post_ra>
// kernel: positionwise_ffn.1
= control target key start
LH: loop header
LB: loop body
LE: loop exit
PB: predicated region body
PF: predicated region fallthrough
CT: control target
= control target key end

     0   :  { %v1291_v0 = vmov 0.0   ;;  %vm1292_vm0 = vmmov 0   ;;  %s1623_s2 = inlined_call_operand.vmem [shape: bf16[128,256], index: 2, kind: input, shape index: {}]   ;;  %s1624_s3 = inlined_call_operand.vmem [shape: bf16[128,256], index: 3, kind: input, shape index: {}]   ;;  %s1625_s0 = inlined_call_operand.vmem [shape: bf16[16,128], index: 0, kind: input, shape index: {}]   ;;  %s1626_s1 = inlined_call_operand.vmem [shape: bf16[16,128], index: 1, kind: input, shape index: {}]   ;;  %s1627_s4 = inlined_call_operand.vmem [shape: f32[1,128], index: 4, kind: input, shape index: {}]   ;;  %s1628_s5 = inlined_call_operand.vmem [shape: f32[1,128], index: 5, kind: input, shape index: {}]   ;;  %s1629_s6 = inlined_call_operand.vmem [shape: f32[1,128], index: 6, kind: input, shape index: {}]   ;;  %s1630_s7 = inlined_call_operand.vmem [shape: f32[1,128], index: 7, kind: input, shape index: {}]   ;;  %s1631_s8 = inlined_call_operand.vmem [shape: f32[1,128], index: 8, kind: input, shape index: {}]   ;;  %s1632_s9 = inlined_call_operand.vmem [shape: f32[1,128], index: 9, kind: input, shape index: {}]   ;;  %s1633_s10 = inlined_call_operand.vmem [shape: bf16[16,128], index: 10, kind: output, shape index: {0}]   ;;  %s1634_s11 = inlined_call_operand.vmem [shape: bf16[16,128], index: 11, kind: output, shape index: {1}]  }
   0x1   :  { %1069 = vmatprep.subr.bf16.mxu0 %v1291_v0  ;;  %1089 = vmatprep.subr.bf16.mxu1 %v1291_v0  ;;  %v1231_v1 = vld [vmem:[%s1623_s2 + $0x70] ss:$8 sps:$4 sm:$0xff]   ;;  %v1232_v2 = vld [vmem:[%s1623_s2 + $0x74] ss:$8 sps:$4 sm:$0xff]   ;;  %v1233_v3 = vld [vmem:[%s1623_s2 + $0x60] ss:$8 sps:$4 sm:$0xff]  }
   0x2   :  { %1085 = vmatprep.mubr.msk.bf16.mxu0 %vm1292_vm0, %v1291_v0  ;;  %1105 = vmatprep.mubr.msk.bf16.mxu1 %vm1292_vm0, %v1291_v0  ;;  %v1234_v4 = vld [vmem:[%s1623_s2 + $0x64] ss:$8 sps:$4 sm:$0xff]   ;;  %v1235_v5 = vld [vmem:[%s1623_s2 + $0x50] ss:$8 sps:$4 sm:$0xff]   ;;  %v1236_v6 = vld [vmem:[%s1623_s2 + $0x54] ss:$8 sps:$4 sm:$0xff]  }
   0x3   :  { %1070 = vmatpush3.bf16.msra.mxu0 %v1231_v1  ;;  %1090 = vmatpush3.bf16.msra.mxu1 %v1232_v2  ;;  %v1237_v7 = vld [vmem:[%s1623_s2 + $0x40] ss:$8 sps:$4 sm:$0xff]   ;;  %v1238_v8 = vld [vmem:[%s1623_s2 + $0x44] ss:$8 sps:$4 sm:$0xff]   ;;  %v1239_v9 = vld [vmem:[%s1623_s2 + $0x30] ss:$8 sps:$4 sm:$0xff]  }
   0x4   :  { %1071 = vmatprep.subr.bf16.mxu0 %v1291_v0  ;;  %1091 = vmatprep.subr.bf16.mxu1 %v1291_v0  ;;  %v1240_v10 = vld [vmem:[%s1623_s2 + $0x34] ss:$8 sps:$4 sm:$0xff]   ;;  %v1241_v11 = vld [vmem:[%s1623_s2 + $0x20] ss:$8 sps:$4 sm:$0xff]   ;;  %v1242_v12 = vld [vmem:[%s1623_s2 + $0x24] ss:$8 sps:$4 sm:$0xff]  }
   0x5   :  { %v1243_v13 = vld [vmem:[%s1623_s2 + $0x10] ss:$8 sps:$4 sm:$0xff]   ;;  %v1244_v14 = vld [vmem:[%s1623_s2 + $0x14] ss:$8 sps:$4 sm:$0xff]   ;;  %v1245_v15 = vld [vmem:[%s1623_s2] ss:$8 sps:$4 sm:$0xff]  }
   0x6   :  { %v1419_v16 = vld [vmem:[%s1625_s0] sm:$0xff]   ;;  %v1249_v19 = vld [vmem:[%s1624_s3 + $0x70] ss:$8 sps:$4 sm:$0xff]   ;;  %v1257_v27 = vld [vmem:[%s1624_s3 + $0x74] ss:$8 sps:$4 sm:$0xff]  }
   0x7   :  { %1072 = vmatpush3.bf16.msra.mxu0 %v1233_v3  ;;  %1092 = vmatpush3.bf16.msra.mxu1 %v1234_v4  ;;  %v1246_v17 = vld [vmem:[%s1623_s2 + $0x4] ss:$8 sps:$4 sm:$0xff]   ;;  %v1250_v20 = vld [vmem:[%s1624_s3 + $0x60] ss:$8 sps:$4 sm:$0xff]   ;;  %v1251_v21 = vld [vmem:[%s1624_s3 + $0x50] ss:$8 sps:$4 sm:$0xff]  }
   0x8   :  { %1073 = vmatprep.subr.bf16.mxu0 %v1291_v0  ;;  %1093 = vmatprep.subr.bf16.mxu1 %v1291_v0  ;;  %v1427_v18 = vld [vmem:[%s1626_s1] sm:$0xff]   ;;  %v1253_v23 = vld [vmem:[%s1624_s3 + $0x30] ss:$8 sps:$4 sm:$0xff]   ;;  %v1261_v29 = vld [vmem:[%s1624_s3 + $0x54] ss:$8 sps:$4 sm:$0xff]  }
   0x9   :  { %v1252_v22 = vld [vmem:[%s1624_s3 + $0x40] ss:$8 sps:$4 sm:$0xff]   ;;  %v1255_v25 = vld [vmem:[%s1624_s3 + $0x10] ss:$8 sps:$4 sm:$0xff]   ;;  %v1259_v28 = vld [vmem:[%s1624_s3 + $0x64] ss:$8 sps:$4 sm:$0xff]  }
   0xa   :  { %v1254_v24 = vld [vmem:[%s1624_s3 + $0x20] ss:$8 sps:$4 sm:$0xff]   ;;  %v1263_v30 = vld [vmem:[%s1624_s3 + $0x44] ss:$8 sps:$4 sm:$0xff]   ;;  %v1265_v31 = vld [vmem:[%s1624_s3 + $0x34] ss:$8 sps:$4 sm:$0xff]  }
   0xb   :  { %1074 = vmatpush3.bf16.msra.mxu0 %v1235_v5  ;;  %1094 = vmatpush3.bf16.msra.mxu1 %v1236_v6  ;;  %v1256_v26 = vld [vmem:[%s1624_s3] ss:$8 sps:$4 sm:$0xff]   ;;  %v1267_v32 = vld [vmem:[%s1624_s3 + $0x24] ss:$8 sps:$4 sm:$0xff]   ;;  %v1269_v33 = vld [vmem:[%s1624_s3 + $0x14] ss:$8 sps:$4 sm:$0xff]  }
   0xc   :  { %1075 = vmatprep.subr.bf16.mxu0 %v1291_v0  ;;  %1095 = vmatprep.subr.bf16.mxu1 %v1291_v0  ;;  %v1271_v34 = vld [vmem:[%s1624_s3 + $0x4] ss:$8 sps:$4 sm:$0xff]   ;;  %v941_v39 = vld [vmem:[%s1627_s4] ss:$0 sm:$0xff]  ;;  %v1258_v50 = vld [vmem:[%s1624_s3 + $0x74] ss:$8 sps:$4 sm:$0xff]  }
   0xd   :  { %v1260_v52 = vld [vmem:[%s1624_s3 + $0x64] ss:$8 sps:$4 sm:$0xff]   ;;  %v1262_v53 = vld [vmem:[%s1624_s3 + $0x54] ss:$8 sps:$4 sm:$0xff]   ;;  %v942_v61 = vld [vmem:[%s1628_s5] ss:$0 sm:$0xff] }
   0xe   :  { %v1264_v54 = vld [vmem:[%s1624_s3 + $0x44] ss:$8 sps:$4 sm:$0xff]   ;;  %v1266_v55 = vld [vmem:[%s1624_s3 + $0x34] ss:$8 sps:$4 sm:$0xff]  }
   0xf   :  { %1076 = vmatpush3.bf16.msra.mxu0 %v1237_v7  ;;  %1096 = vmatpush3.bf16.msra.mxu1 %v1238_v8  ;;  %v1268_v56 = vld [vmem:[%s1624_s3 + $0x24] ss:$8 sps:$4 sm:$0xff]   ;;  %v1270_v63 = vld [vmem:[%s1624_s3 + $0x14] ss:$8 sps:$4 sm:$0xff]  }
  0x10   :  { %1077 = vmatprep.subr.bf16.mxu0 %v1291_v0  ;;  %1097 = vmatprep.subr.bf16.mxu1 %v1291_v0 }
  0x13   :  { %1078 = vmatpush3.bf16.msra.mxu0 %v1239_v9  ;;  %1098 = vmatpush3.bf16.msra.mxu1 %v1240_v10 }
  0x14   :  { %1079 = vmatprep.subr.bf16.mxu0 %v1291_v0  ;;  %1099 = vmatprep.subr.bf16.mxu1 %v1291_v0 }
  0x17   :  { %1080 = vmatpush3.bf16.msra.mxu0 %v1241_v11  ;;  %1100 = vmatpush3.bf16.msra.mxu1 %v1242_v12 }
  0x18   :  { %1081 = vmatprep.subr.bf16.mxu0 %v1291_v0  ;;  %1101 = vmatprep.subr.bf16.mxu1 %v1291_v0 }
  0x1b   :  { %1082 = vmatpush3.bf16.msra.mxu0 %v1243_v13  ;;  %1102 = vmatpush3.bf16.msra.mxu1 %v1244_v14 }
  0x1c   :  { %1083 = vmatprep.subr.bf16.mxu0 %v1291_v0  ;;  %1103 = vmatprep.subr.bf16.mxu1 %v1291_v0 }
  0x1f   :  { %1084 = vmatpush3.bf16.msra.mxu0 %v1245_v15  ;;  %1104 = vmatpush3.bf16.msra.mxu1 %v1246_v17 }
  0x20   :  { %1109 = vmatprep.subr.bf16.mxu0 %v1291_v0  ;;  %1129 = vmatprep.subr.bf16.mxu1 %v1291_v0 }
  0x22   :  { %1086 = vmatmul.mubr.bf16.vlgmr.msra.gmra.mxu0 %v1419_v16  ;;  %1106 = vmatmul.mubr.bf16.vlgmr.msra.gmra.mxu1 %v1427_v18 }
  0x23   :  { %1110 = vmatpush3.bf16.msra.mxu0 %v1232_v2  ;;  %1130 = vmatpush3.bf16.msra.mxu1 %v1231_v1 }
  0x24   :  { %1111 = vmatprep.subr.bf16.mxu0 %v1291_v0  ;;  %1131 = vmatprep.subr.bf16.mxu1 %v1291_v0 }
  0x25   :  { %1125 = vmatprep.mubr.msk.bf16.mxu0 %vm1292_vm0, %v1291_v0  ;;  %1145 = vmatprep.mubr.msk.bf16.mxu1 %vm1292_vm0, %v1291_v0 }
  0x27   :  { %1112 = vmatpush3.bf16.msra.mxu0 %v1234_v4  ;;  %1132 = vmatpush3.bf16.msra.mxu1 %v1233_v3 }
  0x28   :  { %1113 = vmatprep.subr.bf16.mxu0 %v1291_v0  ;;  %1133 = vmatprep.subr.bf16.mxu1 %v1291_v0 }
  0x2b   :  { %1114 = vmatpush3.bf16.msra.mxu0 %v1236_v6  ;;  %1134 = vmatpush3.bf16.msra.mxu1 %v1235_v5 }
  0x2c   :  { %1115 = vmatprep.subr.bf16.mxu0 %v1291_v0  ;;  %1135 = vmatprep.subr.bf16.mxu1 %v1291_v0 }
  0x2f   :  { %1116 = vmatpush3.bf16.msra.mxu0 %v1238_v8  ;;  %1136 = vmatpush3.bf16.msra.mxu1 %v1237_v7  ;;  %v1272_v7 = vld [vmem:[%s1624_s3 + $0x4] ss:$8 sps:$4 sm:$0xff]  }
  0x30   :  { %1117 = vmatprep.subr.bf16.mxu0 %v1291_v0  ;;  %1137 = vmatprep.subr.bf16.mxu1 %v1291_v0 }
  0x33   :  { %1118 = vmatpush3.bf16.msra.mxu0 %v1240_v10  ;;  %1138 = vmatpush3.bf16.msra.mxu1 %v1239_v9 }
  0x34   :  { %1119 = vmatprep.subr.bf16.mxu0 %v1291_v0  ;;  %1139 = vmatprep.subr.bf16.mxu1 %v1291_v0 }
  0x37   :  { %1120 = vmatpush3.bf16.msra.mxu0 %v1242_v12  ;;  %1140 = vmatpush3.bf16.msra.mxu1 %v1241_v11  ;;  %v1273_v11 = vld [vmem:[%s1624_s3 + $0x70] ss:$8 sps:$4 sm:$0xff]  }
  0x38   :  { %1121 = vmatprep.subr.bf16.mxu0 %v1291_v0  ;;  %1141 = vmatprep.subr.bf16.mxu1 %v1291_v0 }
  0x3b   :  { %1122 = vmatpush3.bf16.msra.mxu0 %v1244_v14  ;;  %1142 = vmatpush3.bf16.msra.mxu1 %v1243_v13  ;;  %v1274_v13 = vld [vmem:[%s1624_s3 + $0x60] ss:$8 sps:$4 sm:$0xff]   ;;  %v1275_v14 = vld [vmem:[%s1624_s3 + $0x50] ss:$8 sps:$4 sm:$0xff]  }
  0x3c   :  { %1123 = vmatprep.subr.bf16.mxu0 %v1291_v0  ;;  %1143 = vmatprep.subr.bf16.mxu1 %v1291_v0 }
  0x3f   :  { %1124 = vmatpush3.bf16.msra.mxu0 %v1246_v17  ;;  %1144 = vmatpush3.bf16.msra.mxu1 %v1245_v15  ;;  %v1276_v15 = vld [vmem:[%s1624_s3 + $0x40] ss:$8 sps:$4 sm:$0xff]   ;;  %v1277_v17 = vld [vmem:[%s1624_s3 + $0x30] ss:$8 sps:$4 sm:$0xff]  }
  0x40   :  { %1149 = vmatprep.subr.bf16.mxu0 %v1291_v0  ;;  %1169 = vmatprep.subr.bf16.mxu1 %v1291_v0 }
  0x42   :  { %1126 = vmatmul.mubr.bf16.vlgmr.msra.gmra.mxu0 %v1419_v16  ;;  %1146 = vmatmul.mubr.bf16.vlgmr.msra.gmra.mxu1 %v1427_v18 }
  0x43   :  { %1150 = vmatpush3.bf16.msra.mxu0 %v1249_v19  ;;  %1165 = vmatprep.mubr.msk.bf16.mxu0 %vm1292_vm0, %v1291_v0  ;;  %v1278_v19 = vld [vmem:[%s1624_s3 + $0x20] ss:$8 sps:$4 sm:$0xff]  }
  0x44   :  { %1151 = vmatprep.subr.bf16.mxu0 %v1291_v0  ;;  %1185 = vmatprep.mubr.msk.bf16.mxu1 %vm1292_vm0, %v1291_v0 }
  0x45   :  { %1170 = vmatpush3.bf16.msra.mxu1 %v1257_v27 }
  0x46   :  { %1171 = vmatprep.subr.bf16.mxu1 %v1291_v0 }
  0x47   :  { %1152 = vmatpush3.bf16.msra.mxu0 %v1250_v20  ;;  %v1279_v20 = vld [vmem:[%s1624_s3 + $0x10] ss:$8 sps:$4 sm:$0xff]  }
  0x48   :  { %1153 = vmatprep.subr.bf16.mxu0 %v1291_v0 }
  0x49   :  { %1172 = vmatpush3.bf16.msra.mxu1 %v1259_v28  ;;  %v959_v28 = vld [vmem:[%s1629_s6] ss:$0 sm:$0xff] }
  0x4a   :  { %1173 = vmatprep.subr.bf16.mxu1 %v1291_v0 }
  0x4b   :  { %1154 = vmatpush3.bf16.msra.mxu0 %v1251_v21  ;;  %v1280_v21 = vld [vmem:[%s1624_s3] ss:$8 sps:$4 sm:$0xff]  }
  0x4c   :  { %1155 = vmatprep.subr.bf16.mxu0 %v1291_v0 }
  0x4d   :  { %1174 = vmatpush3.bf16.msra.mxu1 %v1261_v29 }
  0x4e   :  { %1175 = vmatprep.subr.bf16.mxu1 %v1291_v0 }
  0x4f   :  { %1156 = vmatpush3.bf16.msra.mxu0 %v1252_v22 }
  0x50   :  { %1157 = vmatprep.subr.bf16.mxu0 %v1291_v0 }
  0x51   :  { %1176 = vmatpush3.bf16.msra.mxu1 %v1263_v30  ;;  %v598_v30 = vunpack.c.l.bf16 %v1419_v16 }
  0x52   :  { %1177 = vmatprep.subr.bf16.mxu1 %v1291_v0 }
  0x53   :  { %1158 = vmatpush3.bf16.msra.mxu0 %v1253_v23 }
  0x54   :  { %1159 = vmatprep.subr.bf16.mxu0 %v1291_v0 }
  0x55   :  { %1178 = vmatpush3.bf16.msra.mxu1 %v1265_v31 }
  0x56   :  { %1179 = vmatprep.subr.bf16.mxu1 %v1291_v0 }
  0x57   :  { %1160 = vmatpush3.bf16.msra.mxu0 %v1254_v24 }
  0x58   :  { %1161 = vmatprep.subr.bf16.mxu0 %v1291_v0 }
  0x59   :  { %1180 = vmatpush3.bf16.msra.mxu1 %v1267_v32 }
  0x5a   :  { %1181 = vmatprep.subr.bf16.mxu1 %v1291_v0 }
  0x5b   :  { %1162 = vmatpush3.bf16.msra.mxu0 %v1255_v25 }
  0x5c   :  { %1163 = vmatprep.subr.bf16.mxu0 %v1291_v0 }
  0x5d   :  { %1182 = vmatpush3.bf16.msra.mxu1 %v1269_v33 }
  0x5e   :  { %1183 = vmatprep.subr.bf16.mxu1 %v1291_v0 }
  0x5f   :  { %1164 = vmatpush3.bf16.msra.mxu0 %v1256_v26 }
  0x60   :  { %1189 = vmatprep.subr.bf16.mxu0 %v1291_v0 }
  0x61   :  { %1184 = vmatpush3.bf16.msra.mxu1 %v1271_v34 }
  0x62   :  { %1209 = vmatprep.subr.bf16.mxu1 %v1291_v0 }
  0xe2   :  { %v151_v35 = vpop.f32.mrf.mxu0  ;;  %v262_v36 = vpop.f32.mrf.mxu1 }
  0xe3   :  { %v269_v37 = vsub.f32 %v151_v35, %v262_v36 }
  0xe4   :  { %v1087_v38 = vpop.f32.mrf.mxu0  ;;  %v1107_v40 = vpop.f32.mrf.mxu1 }
  0xe5   :  { %v278_v43 = vadd.f32 %v941_v39, %v269_v37  ;;  %v599_v37 = vunpack.c.h.bf16 %v1419_v16  ;;  %v874_v16 = vunpack.c.h.bf16 %v1427_v18 }
  0xe6   :  { %v154_v41 = vpop.f32.mrf.mxu0  ;;  %v265_v42 = vpop.f32.mrf.mxu1 }
  0xe7   :  { %v270_v44 = vsub.f32 %v154_v41, %v265_v42  ;;  %v280_v48 = vmax.f32 %v278_v43, 0.0  ;;  %v980_v43 = vld [vmem:[%s1630_s7] ss:$0 sm:$0xff] }
  0xe8   :  { %v1088_v45 = vpop.f32.mrf.mxu0  ;;  %v1108_v46 = vpop.f32.mrf.mxu1 }
  0xe9   :  { %v279_v47 = vadd.f32 %v941_v39, %v270_v44  ;;  %v873_v45 = vunpack.c.l.bf16 %v1427_v18 }
  0xeb   :  { %v281_v49 = vmax.f32 %v279_v47, 0.0 }
  0xed   :  { %v282_v51 = vpack.c.bf16 %v281_v49, %v280_v48 }
  0xef   :  { %1166 = vmatmul.mubr.bf16.vlgmr.msra.gmra.mxu0 %v282_v51 }
  0xf0   :  { %1190 = vmatpush3.bf16.msra.mxu0 %v1258_v50  ;;  %1205 = vmatprep.mubr.msk.bf16.mxu0 %vm1292_vm0, %v1291_v0 }
  0xf1   :  { %1191 = vmatprep.subr.bf16.mxu0 %v1291_v0 }
  0xf4   :  { %1192 = vmatpush3.bf16.msra.mxu0 %v1260_v52 }
  0xf5   :  { %1193 = vmatprep.subr.bf16.mxu0 %v1291_v0 }
  0xf8   :  { %1194 = vmatpush3.bf16.msra.mxu0 %v1262_v53 }
  0xf9   :  { %1195 = vmatprep.subr.bf16.mxu0 %v1291_v0 }
  0xfc   :  { %1196 = vmatpush3.bf16.msra.mxu0 %v1264_v54  ;;  %v42_v54 = vlaneseq }
  0xfd   :  { %1197 = vmatprep.subr.bf16.mxu0 %v1291_v0 }
 0x100   :  { %1198 = vmatpush3.bf16.msra.mxu0 %v1266_v55  ;;  %v43_v55 = vand.u32 127, %v42_v54 }
 0x101   :  { %1199 = vmatprep.subr.bf16.mxu0 %v1291_v0 }
 0x102   :  { %v317_v57 = vpop.f32.mrf.mxu0  ;;  %v358_v58 = vpop.f32.mrf.mxu1  ;;  %vm44_vm1 = vcmp.lt.s32.totalorder %v43_v55, 32 }
 0x103   :  { %v359_v59 = vadd.f32 %v358_v58, %v317_v57 }
 0x104   :  { %v1127_v60 = vpop.f32.mrf.mxu0  ;;  %1200 = vmatpush3.bf16.msra.mxu0 %v1268_v56  ;;  %v1147_v62 = vpop.f32.mrf.mxu1 }
 0x105   :  { %1201 = vmatprep.subr.bf16.mxu0 %v1291_v0  ;;  %v372_v3 = vadd.f32 %v942_v61, %v359_v59 }
 0x106   :  { %v320_v1 = vpop.f32.mrf.mxu0  ;;  %v361_v2 = vpop.f32.mrf.mxu1 }
 0x107   :  { %v362_v4 = vadd.f32 %v361_v2, %v320_v1  ;;  %v374_v9 = vmax.f32 %v372_v3, 0.0 }
 0x108   :  { %v1128_v5 = vpop.f32.mrf.mxu0  ;;  %1202 = vmatpush3.bf16.msra.mxu0 %v1270_v63  ;;  %v1148_v6 = vpop.f32.mrf.mxu1 }
 0x109   :  { %v373_v8 = vadd.f32 %v942_v61, %v362_v4  ;;  %1203 = vmatprep.subr.bf16.mxu0 %v1291_v0 }
 0x10b   :  { %v375_v10 = vmax.f32 %v373_v8, 0.0 }
 0x10c   :  { %1204 = vmatpush3.bf16.msra.mxu0 %v1272_v7 }
 0x10d   :  { %v376_v12 = vpack.c.bf16 %v375_v10, %v374_v9 }
 0x10f   :  { %1206 = vmatmul.mubr.bf16.vlgmr.msra.gmra.mxu0 %v282_v51  ;;  %1186 = vmatmul.mubr.bf16.vlgmr.msra.gmra.mxu1 %v376_v12 }
 0x110   :  { %1210 = vmatpush3.bf16.msra.mxu1 %v1273_v11  ;;  %1225 = vmatprep.mubr.msk.bf16.mxu1 %vm1292_vm0, %v1291_v0 }
 0x111   :  { %1211 = vmatprep.subr.bf16.mxu1 %v1291_v0 }
 0x114   :  { %1212 = vmatpush3.bf16.msra.mxu1 %v1274_v13 }
 0x115   :  { %1213 = vmatprep.subr.bf16.mxu1 %v1291_v0 }
 0x118   :  { %1214 = vmatpush3.bf16.msra.mxu1 %v1275_v14 }
 0x119   :  { %1215 = vmatprep.subr.bf16.mxu1 %v1291_v0 }
 0x11c   :  { %1216 = vmatpush3.bf16.msra.mxu1 %v1276_v15 }
 0x11d   :  { %1217 = vmatprep.subr.bf16.mxu1 %v1291_v0 }
 0x120   :  { %1218 = vmatpush3.bf16.msra.mxu1 %v1277_v17 }
 0x121   :  { %1219 = vmatprep.subr.bf16.mxu1 %v1291_v0 }
 0x124   :  { %1220 = vmatpush3.bf16.msra.mxu1 %v1278_v19 }
 0x125   :  { %1221 = vmatprep.subr.bf16.mxu1 %v1291_v0 }
 0x128   :  { %1222 = vmatpush3.bf16.msra.mxu1 %v1279_v20 }
 0x129   :  { %1223 = vmatprep.subr.bf16.mxu1 %v1291_v0 }
 0x12c   :  { %1224 = vmatpush3.bf16.msra.mxu1 %v1280_v21 }
 0x12f   :  { %1226 = vmatmul.mubr.bf16.vlgmr.msra.gmra.mxu1 %v376_v12 }
 0x1af   :  { %v475_v22 = vpop.f32.mrf.mxu0 }
 0x1b1   :  { %v1167_v23 = vpop.f32.mrf.mxu0 }
 0x1b3   :  { %v478_v24 = vpop.f32.mrf.mxu0 }
 0x1b5   :  { %v1168_v25 = vpop.f32.mrf.mxu0 }
 0x1cf   :  { %v768_v26 = vpop.f32.mrf.mxu0  ;;  %v580_v27 = vpop.f32.mrf.mxu1 }
 0x1d0   :  { %v587_v29 = vsub.f32 %v475_v22, %v580_v27  ;;  %v960_v22 = vld [vmem:[%s1631_s8] ss:$0 sm:$0xff] }
 0x1d1   :  { %v1207_v31 = vpop.f32.mrf.mxu0  ;;  %v1187_v32 = vpop.f32.mrf.mxu1 }
 0x1d2   :  { %v596_v33 = vadd.f32 %v959_v28, %v587_v29 }
 0x1d3   :  { %v771_v34 = vpop.f32.mrf.mxu0  ;;  %v583_v0 = vpop.f32.mrf.mxu1 }
 0x1d4   :  { %v588_v35 = vsub.f32 %v478_v24, %v583_v0  ;;  %v600_v36 = vadd.f32 %v598_v30, %v596_v33 }
 0x1d5   :  { %v1208_v38 = vpop.f32.mrf.mxu0  ;;  %v1188_v39 = vpop.f32.mrf.mxu1 }
 0x1d6   :  { %v597_v40 = vadd.f32 %v959_v28, %v588_v35  ;;  %602 = vadd.xlane.f32.xlu0 %v600_v36 }
 0x1d8   :  { %v601_v41 = vadd.f32 %v599_v37, %v597_v40 }
 0x1da   :  { %604 = vadd.xlane.f32.xlu0 %v601_v41 }
 0x1ef   :  { %v857_v42 = vpop.f32.mrf.mxu1 }
 0x1f0   :  { %v858_v44 = vadd.f32 %v857_v42, %v768_v26  ;;  %v961_v26 = vld [vmem:[%s1632_s9] ss:$0 sm:$0xff] }
 0x1f1   :  { %v1227_v46 = vpop.f32.mrf.mxu1 }
 0x1f2   :  { %v871_v47 = vadd.f32 %v980_v43, %v858_v44 }
 0x1f3   :  { %v860_v48 = vpop.f32.mrf.mxu1 }
 0x1f4   :  { %v861_v49 = vadd.f32 %v860_v48, %v771_v34  ;;  %v875_v50 = vadd.f32 %v873_v45, %v871_v47 }
 0x1f5   :  { %v1228_v51 = vpop.f32.mrf.mxu1 }
 0x1f6   :  { %v872_v52 = vadd.f32 %v980_v43, %v861_v49  ;;  %877 = vadd.xlane.f32.xlu1 %v875_v50 }
 0x1f8   :  { %v876_v53 = vadd.f32 %v874_v16, %v872_v52 }
 0x1fa   :  { %879 = vadd.xlane.f32.xlu1 %v876_v53 }
 0x25f   :  { %v603_v56 = vpop.xlane.xlu0 %602 }
 0x260   :  { %v606_v57 = vmul.f32 0.03125, %v603_v56 }
 0x262   :  { %v608_v58 = vsub.f32 %v600_v36, %v606_v57 }
 0x263   :  { %v605_v59 = vpop.xlane.xlu0 %604 }
 0x264   :  { %v607_v60 = vmul.f32 0.03125, %v605_v59  ;;  %v612_v61 = vsel %vm44_vm1, %v608_v58, 0.0 }
 0x265   :  { %v614_v62 = vmul.f32 %v612_v61, %v612_v61 }
 0x266   :  { %v609_v63 = vsub.f32 %v601_v41, %v607_v60 }
 0x267   :  { %616 = vadd.xlane.f32.xlu0 %v614_v62 }
 0x268   :  { %v613_v18 = vsel %vm44_vm1, %v609_v63, 0.0 }
 0x269   :  { %v615_v1 = vmul.f32 %v613_v18, %v613_v18 }
 0x26b   :  { %618 = vadd.xlane.f32.xlu1 %v615_v1 }
 0x27f   :  { %v878_v2 = vpop.xlane.xlu1 %877 }
 0x280   :  { %v881_v3 = vmul.f32 0.03125, %v878_v2 }
 0x282   :  { %v883_v4 = vsub.f32 %v875_v50, %v881_v3 }
 0x283   :  { %v880_v5 = vpop.xlane.xlu1 %879 }
 0x284   :  { %v882_v6 = vmul.f32 0.03125, %v880_v5  ;;  %v885_v7 = vsel %vm44_vm1, %v883_v4, 0.0 }
 0x285   :  { %v887_v8 = vmul.f32 %v885_v7, %v885_v7 }
 0x286   :  { %v884_v9 = vsub.f32 %v876_v53, %v882_v6 }
 0x287   :  { %889 = vadd.xlane.f32.xlu0 %v887_v8 }
 0x288   :  { %v886_v10 = vsel %vm44_vm1, %v884_v9, 0.0 }
 0x289   :  { %v888_v11 = vmul.f32 %v886_v10, %v886_v10 }
 0x28b   :  { %891 = vadd.xlane.f32.xlu1 %v888_v11 }
 0x2f0   :  { %v617_v12 = vpop.xlane.xlu0 %616 }
 0x2f1   :  { %v620_v13 = vmul.f32 0.03125, %v617_v12 }
 0x2f3   :  { %v622_v14 = vadd.f32 1e-05, %v620_v13 }
 0x2f4   :  { %v619_v15 = vpop.xlane.xlu1 %618 }
 0x2f5   :  { %1283 = vrsqrt.f32 %v622_v14  ;;  %v621_v17 = vmul.f32 0.03125, %v619_v15 }
 0x2f7   :  { %v623_v19 = vadd.f32 1e-05, %v621_v17 }
 0x2f9   :  { %1285 = vrsqrt.f32 %v623_v19 }
 0x302   :  { %v1284_v20 = vpop.eup %1283 }
 0x303   :  { %v626_v21 = vmul.f32 %v1284_v20, %v612_v61 }
 0x305   :  { %v634_v24 = vmul.f32 %v960_v22, %v626_v21 }
 0x306   :  { %v1286_v23 = vpop.eup %1285 }
 0x307   :  { %v627_v25 = vmul.f32 %v1286_v23, %v613_v18  ;;  %v642_v28 = vadd.f32 %v961_v26, %v634_v24 }
 0x309   :  { %v635_v27 = vmul.f32 %v960_v22, %v627_v25 }
 0x30b   :  { %v643_v29 = vadd.f32 %v961_v26, %v635_v27 }
 0x30d   :  { %v990_v30 = vpack.c.bf16 %v643_v29, %v642_v28 }
 0x30f   :  { %991 = vst [vmem:[%s1633_s10] sm:$0xff] %v990_v30  }
 0x310   :  { %v890_v31 = vpop.xlane.xlu0 %889 }
 0x311   :  { %v893_v32 = vmul.f32 0.03125, %v890_v31 }
 0x313   :  { %v895_v33 = vadd.f32 1e-05, %v893_v32 }
 0x314   :  { %v892_v34 = vpop.xlane.xlu1 %891 }
 0x315   :  { %1287 = vrsqrt.f32 %v895_v33  ;;  %v894_v0 = vmul.f32 0.03125, %v892_v34 }
 0x317   :  { %v896_v35 = vadd.f32 1e-05, %v894_v0 }
 0x319   :  { %1289 = vrsqrt.f32 %v896_v35 }
 0x322   :  { %v1288_v36 = vpop.eup %1287 }
 0x323   :  { %v899_v37 = vmul.f32 %v1288_v36, %v885_v7 }
 0x325   :  { %v901_v39 = vmul.f32 %v960_v22, %v899_v37 }
 0x326   :  { %v1290_v38 = vpop.eup %1289 }
 0x327   :  { %v900_v40 = vmul.f32 %v1290_v38, %v886_v10  ;;  %v903_v42 = vadd.f32 %v961_v26, %v901_v39 }
 0x329   :  { %v902_v41 = vmul.f32 %v960_v22, %v900_v40 }
 0x32b   :  { %v904_v43 = vadd.f32 %v961_v26, %v902_v41 }
 0x32d   :  { %v995_v44 = vpack.c.bf16 %v904_v43, %v903_v42 }
 0x32f   :  { %996 = vst [vmem:[%s1634_s11] sm:$0xff] %v995_v44  }

</bundles_post_ra>
